<compile_context>
chip_gen: v7x
topology: tpu7x:2x2x1
jax: 0.10.0
libtpu: 0.0.40
codegen_flags: <defaults>
</compile_context>

<pallas_src>
import functools
import math

import jax
import jax.numpy as jnp
from jax.experimental import pallas as pl
from jax.experimental.pallas import tpu as pltpu

# bf16 MXU operands (full-rate on v5e/v6e/v7x); accumulation stays f32.
# Set to jnp.float32 if bit-level parity with the f32 reference is required.
MATMUL_DTYPE = jnp.bfloat16

# dtype of the returned attention map; bf16 halves the dominant HBM write.
ATTN_MAP_DTYPE = jnp.float32


def _default_vmem_limit():
    """~48 MiB on v7x (64 MiB physical), ~96 MiB on v5e/v6e (128 MiB physical)."""
    try:
        cap = pltpu.get_tpu_info().vmem_capacity_bytes
    except Exception:
        cap = 64 * 1024 * 1024  # conservative (v7x-sized) fallback
    return int(min(100 * 1024 * 1024, (cap * 3) // 4))


_VMEM_LIMIT = _default_vmem_limit()


def _pick_tile(dim, target, align):
    """Largest tile <= target that divides `dim` and is a multiple of `align`;
    searches downward over aligned candidates, falling back to the full dim
    (always legal) only if no aligned divisor exists."""
    t = min(target, dim)
    t = (t // align) * align
    while t >= align:
        if dim % t == 0:
            return t
        t -= align
    return dim


def _pick_attn_tq(Lq, Lk, D, n_heads, vmem_limit, target=256):
    """Largest query tile whose double-buffered attention blocks fit VMEM."""
    tq = _pick_tile(Lq, target, 8)
    budget = max(vmem_limit - (4 << 20), 1 << 20)
    while True:
        per_step = 8 * (2 * tq * D            # Q tile + Z tile
                        + n_heads * tq * Lk   # attention-map tile
                        + 2 * Lk * D          # full K + V blocks
                        + Lk)                 # mask bias
        if per_step <= budget or tq <= 8:
            return tq
        nxt = _pick_tile(Lq, max(8, tq // 2), 8)
        if nxt >= tq:
            return tq
        tq = nxt


# --------------------------------------------------------------------------
# Tiled linear projection:  y = x @ W + b
#   Also reused for the fused QKV projection (stacked [3, D, D] weights): the
#   x tile stays resident across the projection axis (same block index).
# --------------------------------------------------------------------------
def _linear_kernel(x_ref, w_ref, b_ref, o_ref):
    x = x_ref[...].astype(MATMUL_DTYPE)
    w = w_ref[...].astype(MATMUL_DTYPE)
    o_ref[...] = (
        jnp.dot(x, w, preferred_element_type=jnp.float32) + b_ref[...]
    ).astype(o_ref.dtype)


def linear(x2d, w, b, *, tm=512, tn=512):
    M, Din = x2d.shape
    Dout = w.shape[1]
    tm = _pick_tile(M, tm, 8)
    tn = _pick_tile(Dout, tn, 128)
    return pl.pallas_call(
        _linear_kernel,
        out_shape=jax.ShapeDtypeStruct((M, Dout), jnp.float32),
        grid=(M // tm, Dout // tn),
        in_specs=[
            pl.BlockSpec((tm, Din), lambda i, j: (i, 0)),
            pl.BlockSpec((Din, tn), lambda i, j: (0, j)),
            pl.BlockSpec((1, tn), lambda i, j: (0, j)),
        ],
        out_specs=pl.BlockSpec((tm, tn), lambda i, j: (i, j)),
        compiler_params=pltpu.CompilerParams(
            dimension_semantics=("parallel", "parallel"),
            vmem_limit_bytes=_VMEM_LIMIT,
        ),
    )(x2d, w, b.reshape(1, Dout))


def qkv_projection(x2d, wqkv3, bqkv3, *, tm=512):
    """Fused QKV projection. wqkv3: [3, D, D] (Q weights pre-scaled), bqkv3: [3, 1, D].
    Grid is (M tiles, 3 projections); the x tile block index is constant across the
    projection axis so it is DMA'd from HBM once per M tile."""
    M, Din = x2d.shape
    D = wqkv3.shape[-1]
    tm = _pick_tile(M, tm, 8)
    return pl.pallas_call(
        _linear_kernel,
        out_shape=jax.ShapeDtypeStruct((3, M, D), jnp.float32),
        grid=(M // tm, 3),
        in_specs=[
            pl.BlockSpec((tm, Din), lambda i, j: (i, 0)),
            pl.BlockSpec((None, Din, D), lambda i, j: (j, 0, 0)),
            pl.BlockSpec((None, 1, D), lambda i, j: (j, 0, 0)),
        ],
        out_specs=pl.BlockSpec((None, tm, D), lambda i, j: (j, i, 0)),
        compiler_params=pltpu.CompilerParams(
            dimension_semantics=("parallel", "arbitrary"),
            vmem_limit_bytes=_VMEM_LIMIT,
        ),
    )(x2d, wqkv3, bqkv3)


# --------------------------------------------------------------------------
# Attention kernel: one block = (one batch, one query tile, ALL heads).
#   q block:    (tq, D)    k/v blocks: (Lk, D)    bias block: (1, Lk)
#   outputs:    z (tq, D)  [heads merged, lane-dense],  attn (H, tq, Lk)
# --------------------------------------------------------------------------
def _attn_kernel(q_ref, k_ref, v_ref, bias_ref, z_ref, attn_ref, *, n_heads):
    q = q_ref[...]                   # [tq, D]; 1/sqrt(dk) already folded into Wq
    k = k_ref[...]                   # [Lk, D]
    v = v_ref[...]                   # [Lk, D]
    tq, D = q.shape
    Lk = k.shape[0]
    dk = D // n_heads

    # Hoisted once per grid step (JAX does not CSE broadcast_in_dim).
    bias = jnp.broadcast_to(bias_ref[...], (tq, Lk))

    # TODO(synk): when dk >= 128, a head-major per-head grid avoids the
    # non-128-aligned lane slices below and shards heads across v7x's 2 TCs.
    z_parts = []
    for h in range(n_heads):         # static unroll: all heads in one block
        sl = slice(h * dk, (h + 1) * dk)
        qh = q[:, sl].astype(MATMUL_DTYPE)
        kh = k[:, sl].astype(MATMUL_DTYPE)
        vh = v[:, sl].astype(MATMUL_DTYPE)

        # Contract on the last dim of both operands: no materialized K^T.
        s = jax.lax.dot_general(
            qh, kh, dimension_numbers=(((1,), (1,)), ((), ())),
            preferred_element_type=jnp.float32,
        ) + bias                                           # [tq, Lk]
        s = s - jnp.max(s, axis=-1, keepdims=True)
        e = jnp.exp(s)
        p = e * pl.reciprocal(jnp.sum(e, axis=-1, keepdims=True), approx=True)

        # TODO(synk): attention dropout (p=0.2) is skipped (deterministic / eval mode).
        attn_ref[h] = p.astype(attn_ref.dtype)
        z_parts.append(
            jnp.dot(p.astype(MATMUL_DTYPE), vh, preferred_element_type=jnp.float32)
        )

    # Single lane-dense [tq, D] store with heads merged on lanes.
    z_ref[...] = jnp.concatenate(z_parts, axis=-1).astype(z_ref.dtype)


def _run_attention(arrays, make_qkv_specs, bias, B, Lq, Lk, D, n_heads):
    tq = _pick_attn_tq(Lq, Lk, D, n_heads, _VMEM_LIMIT)
    in_specs = list(make_qkv_specs(tq)) + [
        pl.BlockSpec((None, 1, Lk), lambda b, qi: (b, 0, 0)),  # additive key mask
    ]
    kern = functools.partial(_attn_kernel, n_heads=n_heads)
    return pl.pallas_call(
        kern,
        out_shape=(
            jax.ShapeDtypeStruct((B, Lq, D), jnp.float32),
            jax.ShapeDtypeStruct((B, n_heads, Lq, Lk), ATTN_MAP_DTYPE),
        ),
        grid=(B, Lq // tq),
        in_specs=in_specs,
        out_specs=(
            pl.BlockSpec((None, tq, D), lambda b, qi: (b, qi, 0)),
            pl.BlockSpec((None, n_heads, tq, Lk), lambda b, qi: (b, 0, qi, 0)),
        ),
        compiler_params=pltpu.CompilerParams(
            dimension_semantics=("parallel", "parallel"),
            vmem_limit_bytes=_VMEM_LIMIT,
        ),
    )(*arrays, bias)


def attention_packed(qkv, bias, n_heads):
    """Self-attention fast path: qkv is a packed (3, B, L, D) slab (no copies)."""
    _, B, L, D = qkv.shape

    def specs(tq):
        return (
            pl.BlockSpec((None, None, tq, D), lambda b, qi: (0, b, qi, 0)),  # Q tile
            pl.BlockSpec((None, None, L, D), lambda b, qi: (1, b, 0, 0)),    # full K
            pl.BlockSpec((None, None, L, D), lambda b, qi: (2, b, 0, 0)),    # full V
        )

    return _run_attention((qkv, qkv, qkv), specs, bias, B, L, L, D, n_heads)


def attention_separate(q_p, k_p, v_p, bias, n_heads):
    """Cross-attention path: three separate [B, L, D] projections, no jnp.stack."""
    B, Lq, D = q_p.shape
    Lk = k_p.shape[1]

    def specs(tq):
        return (
            pl.BlockSpec((None, tq, D), lambda b, qi: (b, qi, 0)),
            pl.BlockSpec((None, Lk, D), lambda b, qi: (b, 0, 0)),
            pl.BlockSpec((None, Lk, D), lambda b, qi: (b, 0, 0)),
        )

    return _run_attention((q_p, k_p, v_p), specs, bias, B, Lq, Lk, D, n_heads)


# --------------------------------------------------------------------------
# Parameter init (mirrors nn.Linear uniform(-1/sqrt(fan_in), 1/sqrt(fan_in)));
# the softmax 1/sqrt(d_k) scale is folded into the Q projection (math-equivalent).
# --------------------------------------------------------------------------
def init_params(key, hidden_dim, n_heads):
    ks = jax.random.split(key, 8)
    bound = 1.0 / math.sqrt(hidden_dim)

    def lin(kw, kb):
        w = jax.random.uniform(kw, (hidden_dim, hidden_dim), jnp.float32, -bound, bound)
        b = jax.random.uniform(kb, (hidden_dim,), jnp.float32, -bound, bound)
        return w, b

    wq, bq = lin(ks[0], ks[1])
    wk, bk = lin(ks[2], ks[3])
    wv, bv = lin(ks[4], ks[5])
    wo, bo = lin(ks[6], ks[7])

    scale = 1.0 / math.sqrt(hidden_dim // n_heads)
    wq_s, bq_s = wq * scale, bq * scale

    params = dict(wq=wq_s, bq=bq_s, wk=wk, bk=bk, wv=wv, bv=bv, wo=wo, bo=bo)
    # Stacked QKV weights for the fused self-attention projection: [3, D, D].
    params["wqkv3"] = jnp.stack([wq_s, wk, wv], axis=0)
    params["bqkv3"] = jnp.stack([bq_s, bk, bv], axis=0).reshape(3, 1, hidden_dim)
    return params


# --------------------------------------------------------------------------
# Full forward:  (q, k, v, mask) -> (atten_result [B,L,D], atten_map [B,H,L,L])
# --------------------------------------------------------------------------
def multihead_attention(params, q, k, v, mask, n_heads):
    B, L, D = q.shape
    assert D % n_heads == 0

    # Additive mask bias built once: 0 where keep, -1e9 where masked.
    bias = ((mask.astype(jnp.float32) - 1.0) * 1e9).reshape(B, 1, mask.shape[1])

    if (q is k) and (q is v):
        # Self-attention: fused QKV projection — x read from HBM once; output is
        # already the packed (3, B, L, D) slab the attention kernel indexes into.
        qkv = qkv_projection(q.reshape(B * L, D), params["wqkv3"], params["bqkv3"])
        qkv = qkv.reshape(3, B, L, D)
        z, attn = attention_packed(qkv, bias, n_heads)
    else:
        # Cross-attention: separate tiled projections fed directly (no stack copy).
        q_p = linear(q.reshape(B * L, D), params["wq"], params["bq"]).reshape(B, L, D)
        k_p = linear(k.reshape(-1, D), params["wk"], params["bk"]).reshape(k.shape)
        v_p = linear(v.reshape(-1, D), params["wv"], params["bv"]).reshape(v.shape)
        z, attn = attention_separate(q_p, k_p, v_p, bias, n_heads)

    out = linear(z.reshape(B * L, D), params["wo"], params["bo"]).reshape(B, L, D)
    return out, attn


if __name__ == "__main__":
    B, L, D, H = 2, 8, 32, 4

    key = jax.random.PRNGKey(0)
    kp, kx, kq, kk, kv = jax.random.split(key, 5)

    params = init_params(kp, D, H)

    # mask: 1 = valid token, 0 = padded (second sequence has 5 valid tokens)
    lengths = jnp.array([8, 5], dtype=jnp.int32)
    mask = (jnp.arange(L)[None, :] < lengths[:, None]).astype(jnp.float32)  # [B, L]

    # --- self-attention (typical transMol usage) -> fused QKV path ---
    x = jax.random.normal(kx, (B, L, D), jnp.float32)
    out, attn = multihead_attention(params, x, x, x, mask, H)
    out = jax.block_until_ready(out)
    attn = jax.block_until_ready(attn)
    assert out.shape == (B, L, D)
    assert attn.shape == (B, H, L, L)
    assert bool(jnp.all(jnp.isfinite(out))) and bool(jnp.all(jnp.isfinite(attn)))
    # softmax rows should sum to ~1 (approx reciprocal tolerance)
    row_sums = jnp.sum(attn.astype(jnp.float32), axis=-1)
    assert bool(jnp.all(jnp.abs(row_sums - 1.0) < 5e-2))

    # --- cross-attention (distinct q/k/v) -> general projection path ---
    q_in = jax.random.normal(kq, (B, L, D), jnp.float32)
    k_in = jax.random.normal(kk, (B, L, D), jnp.float32)
    v_in = jax.random.normal(kv, (B, L, D), jnp.float32)
    out2, attn2 = multihead_attention(params, q_in, k_in, v_in, mask, H)
    out2 = jax.block_until_ready(out2)
    attn2 = jax.block_until_ready(attn2)
    assert out2.shape == (B, L, D)
    assert attn2.shape == (B, H, L, L)
    assert bool(jnp.all(jnp.isfinite(out2))) and bool(jnp.all(jnp.isfinite(attn2)))

    print("KERNEL_OK")
</pallas_src>

<mosaic_0001>
module attributes {stable_mosaic.version = 11 : i64} {
  func.func @_linear_kernel(%arg0: i32, %arg1: i32, %arg2: memref<16x32xf32, #tpu.memory_space<vmem>>, %arg3: memref<1x32x32xf32, #tpu.memory_space<vmem>>, %arg4: memref<1x1x32xf32, #tpu.memory_space<vmem>>, %arg5: memref<1x16x32xf32, #tpu.memory_space<vmem>>) attributes {dimension_semantics = [#tpu.dimension_semantics<parallel>, #tpu.dimension_semantics<arbitrary>], iteration_bounds = array<i64: 1, 3>, scalar_prefetch = 0 : i64, scratch_operands = 0 : i64, tpu.core_type = #tpu.core_type<tc>, window_params = [{transform_indices = @transform_0, window_bounds = array<i64: 16, 32>}, {transform_indices = @transform_1, window_bounds = array<i64: 1, 32, 32>}, {transform_indices = @transform_2, window_bounds = array<i64: 1, 1, 32>}, {transform_indices = @transform_3, window_bounds = array<i64: 1, 16, 32>}]} {
    %c0 = arith.constant 0 : index
    %c0_0 = arith.constant 0 : index
    %0 = vector.load %arg2[%c0, %c0_0] : memref<16x32xf32, #tpu.memory_space<vmem>>, vector<16x32xf32>
    %1 = arith.truncf %0 : vector<16x32xf32> to vector<16x32xbf16>
    %c0_1 = arith.constant 0 : index
    %c0_2 = arith.constant 0 : index
    %c0_3 = arith.constant 0 : index
    %2 = vector.load %arg3[%c0_1, %c0_2, %c0_3] : memref<1x32x32xf32, #tpu.memory_space<vmem>>, vector<1x32x32xf32>
    %3 = vector.shape_cast %2 : vector<1x32x32xf32> to vector<32x32xf32>
    %4 = arith.truncf %3 : vector<32x32xf32> to vector<32x32xbf16>
    %cst = arith.constant dense<0.000000e+00> : vector<16x32xf32>
    %5 = tpu.matmul %1, %4, %cst {dimension_numbers = #tpu.dot_dimension_numbers<[1], [0], [0], [1], [0, 0, 1, 1], [], []>} : vector<16x32xbf16>, vector<32x32xbf16>, vector<16x32xf32> -> vector<16x32xf32>
    %c0_4 = arith.constant 0 : index
    %c0_5 = arith.constant 0 : index
    %c0_6 = arith.constant 0 : index
    %6 = vector.load %arg4[%c0_4, %c0_5, %c0_6] : memref<1x1x32xf32, #tpu.memory_space<vmem>>, vector<1x1x32xf32>
    %7 = vector.shape_cast %6 : vector<1x1x32xf32> to vector<1x32xf32>
    %8 = vector.broadcast %7 : vector<1x32xf32> to vector<16x32xf32>
    %9 = arith.addf %5, %8 : vector<16x32xf32>
    %c0_7 = arith.constant 0 : index
    %c0_8 = arith.constant 0 : index
    %c0_9 = arith.constant 0 : index
    %10 = vector.load %arg5[%c0_7, %c0_8, %c0_9] : memref<1x16x32xf32, #tpu.memory_space<vmem>>, vector<1x16x32xf32>
    %11 = vector.shape_cast %10 : vector<1x16x32xf32> to vector<16x32xf32>
    %12 = vector.shape_cast %9 : vector<16x32xf32> to vector<1x16x32xf32>
    tpu.vector_store %arg5[%c0_7, %c0_8, %c0_9], %12 {strides = array<i32>} : memref<1x16x32xf32, #tpu.memory_space<vmem>>, vector<1x16x32xf32>,
    return
  }
  func.func @transform_0(%arg0: i32, %arg1: i32) -> (i32, i32) {
    %c0_i32 = arith.constant 0 : i32
    %c0_i32_0 = arith.constant 0 : i32
    return %arg0, %c0_i32 : i32, i32
  }
  func.func @transform_1(%arg0: i32, %arg1: i32) -> (i32, i32, i32) {
    %c0_i32 = arith.constant 0 : i32
    %c0_i32_0 = arith.constant 0 : i32
    %c0_i32_1 = arith.constant 0 : i32
    return %arg1, %c0_i32, %c0_i32_0 : i32, i32, i32
  }
  func.func @transform_2(%arg0: i32, %arg1: i32) -> (i32, i32, i32) {
    %c0_i32 = arith.constant 0 : i32
    %c0_i32_0 = arith.constant 0 : i32
    %c0_i32_1 = arith.constant 0 : i32
    return %arg1, %c0_i32, %c0_i32_0 : i32, i32, i32
  }
  func.func @transform_3(%arg0: i32, %arg1: i32) -> (i32, i32, i32) {
    %c0_i32 = arith.constant 0 : i32
    %c0_i32_0 = arith.constant 0 : i32
    return %arg1, %arg0, %c0_i32 : i32, i32, i32
  }
}

</mosaic_0001>

<bundles_post_ra>
// kernel: tpu_custom_call.1
= control target key start
LH: loop header
LB: loop body
LE: loop exit
PB: predicated region body
PF: predicated region fallthrough
CT: control target
= control target key end

     0   :  { %8 = vsyncpa [#allocation3], 0  ;;  %s947_s0 = inlined_call_operand.hbm [shape: f32[16,32], index: 0, kind: input, shape index: {}]   ;;  %s948_s1 = inlined_call_operand.hbm [shape: f32[3,32,32], index: 1, kind: input, shape index: {}]   ;;  %s949_s2 = inlined_call_operand.vmem [shape: f32[3,1,32], index: 2, kind: input, shape index: {}]   ;;  %s950_s3 = inlined_call_operand.hbm [shape: f32[3,16,32], index: 3, kind: output, shape index: {}]  }
   0x1   :  { %9 = vsyncpa [#allocation6], 0 }
   0x2   :  { %11 = vsyncpa [#allocation6 + $0x1], 0 }
   0x3   :  { %12 = vsyncpa [#allocation4], 0 }
   0x4   :  { %14 = vsyncpa [#allocation4 + $0x1], 0  ;;  %s715_s12 = smov 0   ;;  %s717_s13 = smov 0  }
   0x5   :  { %s719_s14 = smov 0   ;;  %s721_s15 = smov 0  }
   0x6   :  { %s723_s16 = smov 0   ;;  %s725_s17 = smov 0  }
   0x7 LB: > { %s429_s18 = sadd.s32 4294967295, %s684_s17   ;;  %s430_s19 = sadd.s32 4294967294, %s684_s17   ;;  %s684_s17 = sphi %s725_s17, %s20_s17   ;;  %s680_s16 = sphi %s723_s16, %s973_s16   ;;  %s676_s15 = sphi %s721_s15, %s972_s15   ;;  %s672_s14 = sphi %s719_s14, %s971_s14   ;;  %s668_s13 = sphi %s717_s13, %s970_s13   ;;  %s664_s12 = sphi %s715_s12, %s969_s12  }
   0x8   : > { %p78_p0 = scmp.ne.s32.totalorder %s668_s13, %s664_s12  ;;  %p749_p1 = scmp.eq.s32.totalorder %s429_s18, 0 }
   0x9   : > { %p753_p2 = scmp.eq.s32.totalorder %s429_s18, 2  ;;  %p136_p3 = scmp.eq.s32.totalorder %s430_s19, 2 }
   0xa   : > { %s955_s20 = scalar_select %p749_p1, 1, 0 }
   0xb   : > { %s956_s21 = scalar_select %p753_p2, 1, 0 }
   0xc   : > { %p759_p4 = por %p749_p1, %p78_p0  ;;  %p431_p5 = scmp.ge.s32.totalorder %s684_s17, 1 }
   0xd   : > { %p764_p6 = por %p136_p3, %p78_p0  ;;  %p143_p7 = scmp.lt.s32.totalorder %s684_s17, 4 }
   0xe   : > { %s957_s22 = scalar_select %p759_p4, 1, 0 }
   0xf   : > { %s958_s23 = scalar_select %p764_p6, 1, 0 }
  0x10   : > { %p769_p8 = pnand %p431_p5, %p143_p7  ;;  %s686_s25 = smov [#allocation2]  }
  0x11   : > { %s158_s26 = sshll.u32 %s686_s25, 4  ;;  %s29_s28 = sadd.s32 1, %s680_s16  ;;  %s159_s26 = int_to_ptr.vmem [resolvable:$true] %s158_s26 }
  0x12   : > { %s959_s24 = scalar_select %p769_p8, 1, 0 }
  0x13   : > { %p469_p9 = pneg %p769_p8  ;;  %s540_s4 = scalar_lea.hbm %s947_s0, 256 }
  0x14   : > { %p541_p11 = scmp.ne.s32.totalorder %s947_s0, %s540_s4  ;;  %p547_p3 = scmp.lt.u32.totalorder %s540_s4, %s947_s0 }
  0x15   : > { %p777_p10 = pnand %p469_p9, %p749_p1 }
  0x17   : > { %p542_p12 = pneg %p777_p10 }
  0x19   : > { %p543_p13 = pnand %p542_p12, %p541_p11 }
  0x1b   : > { %p544_p0 = pneg %p543_p13 }
  0x1d   : > { %p549_p5 = pnand %p547_p3, %p544_p0 }
  0x1f   : > { %552 = shalt.err (!%p549_p5)
}
  0x20   : > { %s553_s9 = scalar_lea.vmem %s159_s26, 256  ;;  %p561_p4 = scmp.lt.s32.totalorder %s159_s26, %s159_s26 }
  0x21   : > { %p554_p7 = scmp.ne.s32.totalorder %s159_s26, %s553_s9  ;;  %p562_p1 = scmp.lt.s32.totalorder %s553_s9, %s553_s9 }
  0x23   : > { %p556_p9 = pnand %p554_p7, %p542_p12  ;;  %p563_p8 = por %p562_p1, %p561_p4 }
  0x25   : > { %p557_p6 = pneg %p556_p9 }
  0x27   : > { %p564_p2 = pnand %p563_p8, %p557_p6 }
  0x29   : > { %567 = shalt.err (!%p564_p2)
}
  0x2a   : > { %s687_s10 = smov 128   ;;  %s688_s11 = smov 8  }
  0x2b   : > { %472 = dma.hbm_to_vmem [thread:$0]  (!%p777_p10), %s947_s0, 256, %s159_s26, [#allocation3], %s687_s10, %s687_s10, %s688_s11  }
  0x2c   : > { %p30_p1 = scmp.ge.s32.totalorder %s29_s28, 3  ;;  %s65_s25 = sadd.s32 1, %s672_s14 }
  0x2d   : > { %p72_p2 = scmp.ne.s32.totalorder %s672_s14, %s668_s13  ;;  %p73_p4 = scmp.eq.s32.totalorder %s684_s17, 0 }
  0x2e   : > { %s975_s28 = smov (%p30_p1, %s29_s28), 0  ;;  %p962_p8 = scmp.ne.s32.totalorder %s956_s21, 0 }
  0x2f   : > { %p807_p6 = por %p73_p4, %p72_p2  ;;  %s62_s30 = ssub.s32 %s680_s16, %s975_s28 }
  0x30   : > { %p813_p11 = por %p962_p8, %p72_p2  ;;  %p482_p12 = scmp.lt.s32.totalorder %s684_s17, 3 }
  0x31   : > { %p63_p10 = scmp.eq.s32.totalorder %s62_s30, 0  ;;  %s172_s26 = sand.u32 1, %s672_s14  }
  0x32   : > { %s434_s4 = sshll.u32 %s172_s26, 5  ;;  %s448_s6 = sshll.u32 %s680_s16, 9 }
  0x33   : > { %s822_s5 = scalar_select %p63_p10, %s672_s14, %s65_s25  }
  0x34   : > { %s828_s9 = scalar_lea.hbm %s948_s1, %s448_s6  ;;  %s176_s21 = scalar_lea.vmem [#allocation5], %s434_s4 }
  0x35   : > { %s183_s18 = sshll.u32 %s176_s21, 4  ;;  %p834_p13 = pnand %p482_p12, %p807_p6  ;;  %s830_s18 = int_to_ptr.vmem [resolvable:$true] %s183_s18 }
  0x36   : > { %s838_s25 = scalar_lea.sflag [#allocation6], %s172_s26  ;;  %s568_s30 = scalar_lea.hbm %s828_s9, 512 }
  0x37   : > { %p569_p0 = scmp.ne.s32.totalorder %s828_s9, %s568_s30  ;;  %p570_p3 = pneg %p834_p13 }
  0x38   : > { %s573_s29 = scalar_lea.hbm %s948_s1, 1536  ;;  %p574_p9 = scmp.lt.u32.totalorder %s828_s9, %s948_s1 }
  0x39   : > { %p571_p5 = pnand %p570_p3, %p569_p0  ;;  %p575_p1 = scmp.lt.u32.totalorder %s573_s29, %s568_s30 }
  0x3a   : > { %p577_p4 = scmp.lt.u32.totalorder %s568_s30, %s828_s9 }
  0x3b   : > { %p572_p7 = pneg %p571_p5  ;;  %p576_p2 = por %p575_p1, %p574_p9 }
  0x3d   : > { %p578_p6 = por %p577_p4, %p576_p2 }
  0x3f   : > { %p579_p8 = pnand %p578_p6, %p572_p7 }
  0x41   : > { %582 = shalt.err (!%p579_p8)
}
  0x42   : > { %s583_s26 = scalar_lea.vmem %s830_s18, 512  ;;  %s689_s21 = smov [#allocation5]  }
  0x43   : > { %p584_p12 = scmp.ne.s32.totalorder %s830_s18, %s583_s26  ;;  %s588_s4 = sshll.u32 %s689_s21, 4  ;;  %s589_s4 = int_to_ptr.vmem [resolvable:$false] %s588_s4 }
  0x44   : > { %s590_s6 = scalar_lea.vmem %s589_s4, 1024  ;;  %p591_p5 = scmp.lt.s32.totalorder %s830_s18, %s589_s4 }
  0x45   : > { %p586_p10 = pnand %p584_p12, %p570_p3  ;;  %p592_p9 = scmp.lt.s32.totalorder %s590_s6, %s583_s26 }
  0x47   : > { %p587_p0 = pneg %p586_p10  ;;  %p593_p1 = por %p592_p9, %p591_p5 }
  0x49   : > { %p594_p2 = pnand %p593_p1, %p587_p0 }
  0x4b   : > { %597 = shalt.err (!%p594_p2)
}
  0x4c   : > { %476 = dma.hbm_to_vmem [thread:$0]  (!%p834_p13), %s828_s9, 512, %s830_s18, %s838_s25, %s687_s10, %s687_s10, %s688_s11  }
  0x4d   : > { %p965_p3 = scmp.ne.s32.totalorder %s959_s24, 0 }
  0x4e   : > { %p966_p7 = scmp.ne.s32.totalorder (!%p965_p3), %s955_s20, 0 }
  0x4f   : > { %201 = sbr.rel (%p965_p3) target bundleno = 332 (0x14c), region = 32 }
  0x56   : > { %651 = dma.done.wait (%p966_p7), [#allocation3], 256  }
  0x57   : > { %653 = vsyncadd (%p966_p7), [#allocation3], 4294967040  ;;  %s876_s30 = sand.u32 1, %s668_s13   ;;  %p967_p4 = scmp.ne.s32.totalorder %s957_s22, 0 }
  0x58   : > { %s439_s19 = sshll.u32 %s876_s30, 5  ;;  %s208_s29 = scalar_lea.sflag [#allocation6], %s876_s30 }
  0x59   : > { %s211_s7 = scalar_lea.vmem [#allocation5], %s439_s19 }
  0x5a   : > { %655 = dma.done.wait (%p967_p4), %s208_s29, 512  }
  0x5b   : > { %657 = vsyncadd (%p967_p4), %s208_s29, 4294966784  ;;  %v690_v0 = vmov 0.0   ;;  %vm691_vm0 = vmmov 0   ;;  %v246_v1 = vld [vmem:[%s211_s7] sm:$0xff]  ;;  %v247_v2 = vld [vmem:[%s211_s7 + $0x8] sm:$0xff]  ;;  %vm259_vm1 = vcmask 261120  }
  0x5c   : > { %453 = vmatprep.subr.bf16.mxu0 %v690_v0  ;;  %457 = vmatprep.mubr.msk.bf16.mxu0 %vm691_vm0, %v690_v0  ;;  %v248_v3 = vld [vmem:[%s211_s7 + $0x10] sm:$0xff]  ;;  %v250_v4 = vpack.c.bf16 %v247_v2, %v246_v1  ;;  %v249_v5 = vld [vmem:[%s211_s7 + $0x18] sm:$0xff]  ;;  %p238_p13 = scmp.lt.s32.totalorder %s676_s15, 2  ;;  %s440_s22 = sshll.u32 %s876_s30, 4 }
  0x5d   : > { %v251_v6 = vpack.c.bf16 %v249_v5, %v248_v3  ;;  %v243_v7 = vld [vmem:[#allocation2] sm:$0xff]  ;;  %v244_v8 = vld [vmem:[#allocation2 + $0x8] sm:$0xff]  ;;  %s236_s9 = scalar_lea.vmem [#allocation7], %s440_s22  ;;  %s449_s25 = sshll.u32 %s676_s15, 8 }
  0x5e   : > { %454 = vmatpush3.bf16.msra.mxu0 %v250_v4  ;;  %v245_v9 = vpack.c.bf16 %v244_v8, %v243_v7  ;;  %s239_s20 = scalar_select %p238_p13, %s676_s15, 2 }
  0x5f   : > { %455 = vmatprep.subr.bf16.mxu0 %v690_v0  ;;  %s322_s18 = sshll.u32 %s236_s9, 4  ;;  %s897_s21 = scalar_lea.hbm %s950_s3, %s449_s25  ;;  %s892_s18 = int_to_ptr.vmem [resolvable:$true] %s322_s18 }
  0x60   : > { %s240_s11 = scalar_lea.vmem %s949_s2, %s239_s20  ;;  %s307_s15 = scalar_lea.sflag [#allocation4], %s876_s30 }
  0x61   : > { %v441_v10 = vld [vmem:[%s240_s11] ss:$0 sm:$0xff]  ;;  %s598_s4 = scalar_lea.vmem %s892_s18, 256  ;;  %s692_s6 = smov [#allocation7]  }
  0x62   : > { %456 = vmatpush3.bf16.msra.mxu0 %v251_v6  ;;  %p599_p6 = scmp.ne.s32.totalorder %s892_s18, %s598_s4  ;;  %s602_s19 = sshll.u32 %s692_s6, 4  ;;  %s603_s19 = int_to_ptr.vmem [resolvable:$false] %s602_s19 }
  0x63   : > { %s604_s29 = scalar_lea.vmem %s603_s19, 512  ;;  %p605_p10 = scmp.lt.s32.totalorder %s892_s18, %s603_s19 }
  0x64   : > { %p600_p8 = pnand %p599_p6, %p813_p11  ;;  %p606_p0 = scmp.lt.s32.totalorder %s604_s29, %s598_s4 }
  0x65   : > { %458 = vmatmul.mubr.msk.bf16.vlgmr.msra.gmra.mrb[0].mxu0 %vm259_vm1, %v245_v9 }
  0x66   : > { %p601_p12 = pneg %p600_p8  ;;  %p607_p5 = por %p606_p0, %p605_p10 }
  0x68   : > { %p608_p9 = pnand %p607_p5, %p601_p12 }
 0x138   : > { %v297_v11 = vpop.f32.mrb[0].mxu0 }
 0x139   : > { %v298_v12 = vadd.f32 %v441_v10, %v297_v11  ;;  %v459_v13 = vpop.f32.mrb[1].mxu0 }
 0x13a   : > { %v300_v14 = vpop.f32.mrb[2].mxu0 }
 0x13b   : > { %304 = vst.msk [vmem:[%s236_s9] sm:$0xff] %vm259_vm1, %v298_v12  ;;  %v301_v15 = vadd.f32 %v441_v10, %v300_v14  ;;  %v460_v16 = vpop.f32.mrb[3].mxu0 }
 0x13d   : > { %305 = vst.msk [vmem:[%s236_s9 + $0x8] sm:$0xff] %vm259_vm1, %v301_v15 }
 0x13e   : > { %611 = shalt.err (!%p608_p9)
}
 0x13f   : > { %s612_s7 = scalar_lea.hbm %s897_s21, 256  ;;  %s616_s24 = scalar_lea.hbm %s950_s3, 768 }
 0x140   : > { %p613_p1 = scmp.ne.s32.totalorder %s897_s21, %s612_s7  ;;  %p617_p7 = scmp.lt.u32.totalorder %s897_s21, %s950_s3 }
 0x141   : > { %p618_p4 = scmp.lt.u32.totalorder %s616_s24, %s612_s7  ;;  %p620_p6 = scmp.lt.u32.totalorder %s612_s7, %s897_s21 }
 0x142   : > { %p614_p2 = pnand %p613_p1, %p813_p11 }
 0x143   : > { %p619_p13 = por %p618_p4, %p617_p7 }
 0x144   : > { %p615_p3 = pneg %p614_p2 }
 0x145   : > { %p621_p8 = por %p620_p6, %p619_p13 }
 0x147   : > { %p622_p12 = pnand %p621_p8, %p615_p3 }
 0x149   : > { %625 = shalt.err (!%p622_p12)
}
 0x14a   : > { %s693_s9 = smov 128   ;;  %s694_s25 = smov 8  }
 0x14b   : > { %467 = dma.vmem_to_hbm [thread:$0]  (%p813_p11), %s892_s18, 256, %s897_s21, %s307_s15, %s693_s9, %s693_s9, %s694_s25  }
 0x14c PF: > { %p484_p10 = scmp.ge.s32.totalorder %s684_s17, 2  ;;  %s337_s8 = sand.u32 1, %s664_s12  }
 0x14d   : > { %p968_p0 = scmp.ne.s32.totalorder %s958_s23, 0  ;;  %s338_s26 = scalar_lea.sflag [#allocation4], %s337_s8 }
 0x14f   : > { %p478_p5 = pnand %p484_p10, %p968_p0 }
 0x151   : > { %659 = dma.done.wait (!%p478_p5), %s338_s26, 256  }
 0x152   : > { %661 = vsyncadd (!%p478_p5), %s338_s26, 4294967040  ;;  %s20_s17 = sadd.s32 1, %s684_s17   ;;  %s969_s12 = smov %s668_s13 }
 0x153   : > { %p17_p9 = scmp.ge.s32.totalorder %s20_s17, 5   ;;  %s970_s13 = smov %s672_s14 }
 0x154   : > { %s971_s14 = smov %s822_s5  ;;  %s972_s15 = smov %s680_s16 }
 0x155   : > { %s973_s16 = smov %s975_s28  ;;  %19 = sbr.rel (!%p17_p9) target bundleno = 7 (0x7), region = 86 }
 0x15c   :  { %343 = vsyncpa [#allocation3], 1 }
 0x15d   :  { %345 = vsyncpa [#allocation3 + $0x1], 1 }
 0x15e   :  { %346 = vsyncpa [#allocation6], 1 }
 0x15f   :  { %348 = vsyncpa [#allocation6 + $0x1], 1 }
 0x160   :  { %349 = vsyncpa [#allocation4], 1 }
 0x161   :  { %351 = vsyncpa [#allocation4 + $0x1], 1 }

</bundles_post_ra>
